<compile_context>
chip_gen: v6e
topology: v6e:2x2x1
jax: 0.10.0
libtpu: 0.0.40
codegen_flags: <defaults>
</compile_context>

<pallas_src>
import jax
import jax.numpy as jnp
from jax.experimental import pallas as pl
from jax.experimental.pallas import tpu as pltpu


_TARGET_BLOCK_BYTES = 4 * 1024 * 1024   # per x/out tile (~knee of the HBM roofline)
_LANE_TILE_CAP = 4096                   # tall-narrow blocks; amortize table streams over rows
_VMEM_LIMIT_BYTES = 48 * 1024 * 1024    # fits v7x 64 MiB physical; > v5e's 16 MiB default


def _rope_kernel(x_ref, cos_ref, sa_ref, sb_ref, o_ref):
    """One (rows, lanes) block: x_ref/o_ref are (tb, tc); tables are (1, tc)."""
    x = x_ref[...]
    n = x.shape[1]
    x_next = pltpu.roll(x, shift=n - 1, axis=1)   # x_next[:, p] = x[:, p + 1]
    x_prev = pltpu.roll(x, shift=1, axis=1)       # x_prev[:, p] = x[:, p - 1]
    o_ref[...] = x * cos_ref[...] + x_next * sa_ref[...] + x_prev * sb_ref[...]


def _divisors(n: int):
    out, i = set(), 1
    while i * i <= n:
        if n % i == 0:
            out.add(i)
            out.add(n // i)
        i += 1
    return out


def _pick_tiles(BH: int, S: int, D: int, esize: int):
    """Pick (row_tile, lane_tile) for the flattened (BH, S*D) problem."""
    SD = S * D
    pack = max(32 // esize, 8)   # native sublane packing: 8 f32 / 16 bf16 / 32 int8
    # Lane tile = k*D with k | S (tile ends on a D boundary), 128-aligned or full row.
    valid = sorted(k * D for k in _divisors(S) if (k * D) % 128 == 0 or k * D == SD)
    under = [tc for tc in valid if tc <= _LANE_TILE_CAP]
    tc = max(under) if under else min(valid)
    # Row tile: fill the per-buffer byte target, rounded to the sublane packing.
    rows_budget = max(_TARGET_BLOCK_BYTES // (tc * esize), pack)
    tb = BH if BH <= rows_budget else max((rows_budget // pack) * pack, pack)
    # Keep a parallel grid axis with extent >= 2 when possible (v7x 2-TC sharding).
    if SD // tc < 2 and tb >= BH and BH >= 2 * pack:
        tb = max((((BH + 1) // 2) // pack) * pack, pack)
    return int(tb), int(tc)


class RoPEEmbeddingsPallas:
    """JAX/Pallas port of the PyTorch RoPEEmbeddings forward (select_mask=None path)."""

    def __init__(self, dim: int, seq_len: int, dim_embedding_pct: float = 0.5,
                 base: int = 10000):
        self.dim = dim
        self.effective_dim = int(dim * dim_embedding_pct)
        assert self.effective_dim % 2 == 0, "effective_dim must be even (as in the torch module)"
        self.seq_len = seq_len
        self.dim_embedding_pct = dim_embedding_pct
        self.base = base
        self._table_cache = {}

    def _thetas(self, num_pos: int, offset: int = 0) -> jnp.ndarray:
        """Mirror of torch _calculate_thetas (select_mask=None), first num_pos rows."""
        eff = self.effective_dim
        j = jnp.arange(1, eff // 2 + 1, dtype=jnp.float32)
        freqs = jnp.float32(self.base) ** (-2.0 * j)   # faithful to torch: no /eff scaling
        freqs = jnp.repeat(freqs, 2)                   # pairwise repeat_interleave
        pos = jnp.arange(1 + offset, num_pos + 1 + offset, dtype=jnp.float32)
        return pos[:, None] * freqs[None, :]           # (num_pos, eff)

    def _baked_tables(self, S: int, D: int, offset: int, dtype):
        """Full-width (1, S*D) tables: cosF (1 on pass-through lanes), sinA
        (-sin on even rotated lanes), sinB (+sin on odd rotated lanes).
        Cached across calls keyed on (S, D, offset, dtype)."""
        key = (S, D, offset, jnp.dtype(dtype).name)
        hit = self._table_cache.get(key)
        if hit is not None:
            return hit
        eff = self.effective_dim
        th = self._thetas(S, offset)                   # (S, eff) f32
        cos, sin = jnp.cos(th), jnp.sin(th)
        even = (jnp.arange(eff) % 2) == 0
        sin_a = jnp.where(even, -sin, 0.0)             # multiplies x[d + 1]
        sin_b = jnp.where(even, 0.0, sin)              # multiplies x[d - 1]
        if eff < D:
            pad = D - eff
            cos = jnp.concatenate([cos, jnp.ones((S, pad), jnp.float32)], axis=1)
            sin_a = jnp.concatenate([sin_a, jnp.zeros((S, pad), jnp.float32)], axis=1)
            sin_b = jnp.concatenate([sin_b, jnp.zeros((S, pad), jnp.float32)], axis=1)
        as_row = lambda t: t.reshape(1, S * D).astype(dtype)
        tables = (as_row(cos), as_row(sin_a), as_row(sin_b))
        self._table_cache[key] = tables
        return tables

    def __call__(self, x: jnp.ndarray, total_seq_len: int = 0, offset: int = 0):
        # TODO(synk): select_mask (Mixture-of-Depths) branch not implemented —
        # would require scalar-prefetch gather of per-batch position indices.
        B, H, S, D = x.shape
        cos_t, sin_a, sin_b = self._baked_tables(S, D, offset, x.dtype)

        BH, SD = B * H, S * D
        xf = x.reshape(BH, SD)                         # contiguous reshape, no copy
        esize = jnp.dtype(x.dtype).itemsize
        tb, tc = _pick_tiles(BH, S, D, esize)
        # Lane blocks outermost / row blocks innermost: the three table blocks keep
        # the same block index across the whole inner axis, so each (1, tc) table
        # slice is DMA'd once per lane block instead of once per grid step.
        grid = (SD // tc, pl.cdiv(BH, tb))

        out = pl.pallas_call(
            _rope_kernel,
            out_shape=jax.ShapeDtypeStruct((BH, SD), x.dtype),
            grid=grid,
            in_specs=[
                pl.BlockSpec((tb, tc), lambda c, r: (r, c)),
                pl.BlockSpec((1, tc), lambda c, r: (0, c)),
                pl.BlockSpec((1, tc), lambda c, r: (0, c)),
                pl.BlockSpec((1, tc), lambda c, r: (0, c)),
            ],
            out_specs=pl.BlockSpec((tb, tc), lambda c, r: (r, c)),
            compiler_params=pltpu.CompilerParams(
                dimension_semantics=("parallel", "parallel"),
                vmem_limit_bytes=_VMEM_LIMIT_BYTES),
        )(xf, cos_t, sin_a, sin_b)
        return out.reshape(B, H, S, D)


def _reference(x, rope: RoPEEmbeddingsPallas, offset: int = 0):
    """Pure-JAX reference reproducing the torch forward (select_mask=None)."""
    B, H, S, D = x.shape
    eff = rope.effective_dim
    th = rope._thetas(S, offset)
    x_pos, x_pass = x[..., :eff], x[..., eff:]
    x_cos = jnp.cos(th) * x_pos
    pairs = x_pos.reshape(B, H, S, eff // 2, 2)
    rot = jnp.stack([-pairs[..., 1], pairs[..., 0]], axis=-1).reshape(B, H, S, eff)
    out_pos = x_cos + rot * jnp.sin(th)
    if eff < D:
        return jnp.concatenate([out_pos, x_pass], axis=-1)
    return out_pos


if __name__ == "__main__":
    key = jax.random.PRNGKey(0)
    max_seq_len = 16   # exercises the x.size(2) < self.seq_len slicing branch

    # Case 1: partial rotation (dim_embedding_pct=0.5), offset=0.
    B, H, S, D = 2, 4, 8, 64
    x = jax.random.normal(key, (B, H, S, D), dtype=jnp.float32)
    rope = RoPEEmbeddingsPallas(dim=D, seq_len=max_seq_len, dim_embedding_pct=0.5)
    out = jax.block_until_ready(rope(x))
    assert out.shape == (B, H, S, D) and out.dtype == jnp.float32
    ref = _reference(x, rope)
    assert jnp.allclose(out, ref, rtol=1e-5, atol=1e-5), float(jnp.max(jnp.abs(out - ref)))

    # Case 2: full rotation (dim_embedding_pct=1.0) with a nonzero offset.
    rope_full = RoPEEmbeddingsPallas(dim=D, seq_len=max_seq_len, dim_embedding_pct=1.0)
    out_full = jax.block_until_ready(rope_full(x, offset=3))
    ref_full = _reference(x, rope_full, offset=3)
    assert jnp.allclose(out_full, ref_full, rtol=1e-5, atol=1e-5), float(
        jnp.max(jnp.abs(out_full - ref_full)))
    out_full2 = jax.block_until_ready(rope_full(x, offset=3))   # cached-table path
    assert jnp.allclose(out_full2, ref_full, rtol=1e-5, atol=1e-5)

    # Case 3: BH not a multiple of the row tile (ragged last row block; BH=20 -> tb=8).
    B3, H3 = 5, 4
    x3 = jax.random.normal(jax.random.PRNGKey(0), (B3, H3, S, D), dtype=jnp.float32)
    out3 = jax.block_until_ready(rope(x3))
    ref3 = _reference(x3, rope)
    assert jnp.allclose(out3, ref3, rtol=1e-5, atol=1e-5), float(jnp.max(jnp.abs(out3 - ref3)))

    print("KERNEL_OK")
</pallas_src>

<mosaic_0001>
module attributes {stable_mosaic.version = 11 : i64} {
  func.func @_rope_kernel(%arg0: i32, %arg1: i32, %arg2: memref<8x512xf32, #tpu.memory_space<vmem>>, %arg3: memref<1x512xf32, #tpu.memory_space<vmem>>, %arg4: memref<1x512xf32, #tpu.memory_space<vmem>>, %arg5: memref<1x512xf32, #tpu.memory_space<vmem>>, %arg6: memref<8x512xf32, #tpu.memory_space<vmem>>) attributes {dimension_semantics = [#tpu.dimension_semantics<parallel>, #tpu.dimension_semantics<parallel>], iteration_bounds = array<i64: 1, 1>, scalar_prefetch = 0 : i64, scratch_operands = 0 : i64, tpu.core_type = #tpu.core_type<tc>, window_params = [{transform_indices = @transform_0, window_bounds = array<i64: 8, 512>}, {transform_indices = @transform_1, window_bounds = array<i64: 1, 512>}, {transform_indices = @transform_2, window_bounds = array<i64: 1, 512>}, {transform_indices = @transform_3, window_bounds = array<i64: 1, 512>}, {transform_indices = @transform_4, window_bounds = array<i64: 8, 512>}]} {
    %c0 = arith.constant 0 : index
    %c0_0 = arith.constant 0 : index
    %0 = vector.load %arg2[%c0, %c0_0] : memref<8x512xf32, #tpu.memory_space<vmem>>, vector<8x512xf32>
    %c511_i32 = arith.constant 511 : i32
    %1 = tpu.dynamic_rotate %0 by %c511_i32 dim 1 : vector<8x512xf32>, i32 -> vector<8x512xf32>
    %c1_i32 = arith.constant 1 : i32
    %2 = tpu.dynamic_rotate %0 by %c1_i32 dim 1 : vector<8x512xf32>, i32 -> vector<8x512xf32>
    %c0_1 = arith.constant 0 : index
    %c0_2 = arith.constant 0 : index
    %3 = vector.load %arg3[%c0_1, %c0_2] : memref<1x512xf32, #tpu.memory_space<vmem>>, vector<1x512xf32>
    %4 = vector.broadcast %3 : vector<1x512xf32> to vector<8x512xf32>
    %5 = arith.mulf %0, %4 : vector<8x512xf32>
    %c0_3 = arith.constant 0 : index
    %c0_4 = arith.constant 0 : index
    %6 = vector.load %arg4[%c0_3, %c0_4] : memref<1x512xf32, #tpu.memory_space<vmem>>, vector<1x512xf32>
    %7 = vector.broadcast %6 : vector<1x512xf32> to vector<8x512xf32>
    %8 = arith.mulf %1, %7 : vector<8x512xf32>
    %9 = arith.addf %5, %8 : vector<8x512xf32>
    %c0_5 = arith.constant 0 : index
    %c0_6 = arith.constant 0 : index
    %10 = vector.load %arg5[%c0_5, %c0_6] : memref<1x512xf32, #tpu.memory_space<vmem>>, vector<1x512xf32>
    %11 = vector.broadcast %10 : vector<1x512xf32> to vector<8x512xf32>
    %12 = arith.mulf %2, %11 : vector<8x512xf32>
    %13 = arith.addf %9, %12 : vector<8x512xf32>
    %c0_7 = arith.constant 0 : index
    %c0_8 = arith.constant 0 : index
    %14 = vector.load %arg6[%c0_7, %c0_8] : memref<8x512xf32, #tpu.memory_space<vmem>>, vector<8x512xf32>
    tpu.vector_store %arg6[%c0_7, %c0_8], %13 {strides = array<i32>} : memref<8x512xf32, #tpu.memory_space<vmem>>, vector<8x512xf32>,
    return
  }
  func.func @transform_0(%arg0: i32, %arg1: i32) -> (i32, i32) {
    %c0_i32 = arith.constant 0 : i32
    return %arg1, %arg0 : i32, i32
  }
  func.func @transform_1(%arg0: i32, %arg1: i32) -> (i32, i32) {
    %c0_i32 = arith.constant 0 : i32
    %c0_i32_0 = arith.constant 0 : i32
    return %c0_i32, %arg0 : i32, i32
  }
  func.func @transform_2(%arg0: i32, %arg1: i32) -> (i32, i32) {
    %c0_i32 = arith.constant 0 : i32
    %c0_i32_0 = arith.constant 0 : i32
    return %c0_i32, %arg0 : i32, i32
  }
  func.func @transform_3(%arg0: i32, %arg1: i32) -> (i32, i32) {
    %c0_i32 = arith.constant 0 : i32
    %c0_i32_0 = arith.constant 0 : i32
    return %c0_i32, %arg0 : i32, i32
  }
  func.func @transform_4(%arg0: i32, %arg1: i32) -> (i32, i32) {
    %c0_i32 = arith.constant 0 : i32
    return %arg1, %arg0 : i32, i32
  }
}

</mosaic_0001>

<bundles_post_ra>
// kernel: tpu_custom_call.1
= control target key start
LH: loop header
LB: loop body
LE: loop exit
PB: predicated region body
PF: predicated region fallthrough
CT: control target
= control target key end

     0   :  { %9 = vsyncpa [#allocation3], 0  ;;  %s337_s0 = inlined_call_operand.hbm [shape: f32[8,512], index: 0, kind: input, shape index: {}]   ;;  %s338_s1 = inlined_call_operand.hbm [shape: f32[1,512], index: 1, kind: input, shape index: {}]   ;;  %s339_s2 = inlined_call_operand.hbm [shape: f32[1,512], index: 2, kind: input, shape index: {}]   ;;  %s340_s3 = inlined_call_operand.vmem [shape: f32[1,512], index: 3, kind: input, shape index: {}]   ;;  %s341_s4 = inlined_call_operand.hbm [shape: f32[8,512], index: 4, kind: output, shape index: {}]  }
   0x1   :  { %10 = vsyncpa [#allocation6], 0 }
   0x2   :  { %11 = vsyncpa [#allocation4], 0  ;;  %s283_s15 = smov [#allocation5]   ;;  %s284_s17 = smov [#allocation2]  }
   0x3   :  { %s28_s16 = sshll.u32 %s283_s15, 4  ;;  %s18_s18 = sshll.u32 %s284_s17, 4  ;;  %s29_s16 = int_to_ptr.vmem [resolvable:$true] %s28_s16  ;;  %s19_s18 = int_to_ptr.vmem [resolvable:$true] %s18_s18 }
   0x4   :  { %s205_s19 = scalar_lea.vmem %s29_s16, 64  ;;  %p210_p1 = scmp.lt.s32.totalorder %s29_s16, %s29_s16 }
   0x5   :  { %p206_p0 = scmp.ne.s32.totalorder %s29_s16, %s205_s19  ;;  %p211_p2 = scmp.lt.s32.totalorder %s205_s19, %s205_s19 }
   0x7   :  { %p212_p3 = por %p211_p2, %p210_p1 }
   0x9   :  { %p213_p4 = pnand %p212_p3, %p206_p0 }
   0xb   :  { %216 = shalt.err (!%p213_p4)
}
   0xc   :  { %31 = dma.hbm_to_vmem [thread:$0]  %s338_s1, 64, %s29_s16, [#allocation6]  }
   0xd   :  { %s225_s22 = scalar_lea.vmem %s19_s18, 512  ;;  %p230_p6 = scmp.lt.s32.totalorder %s19_s18, %s19_s18 }
   0xe   :  { %p226_p5 = scmp.ne.s32.totalorder %s19_s18, %s225_s22  ;;  %p231_p7 = scmp.lt.s32.totalorder %s225_s22, %s225_s22 }
  0x10   :  { %p232_p8 = por %p231_p7, %p230_p6 }
  0x12   :  { %p233_p9 = pnand %p232_p8, %p226_p5 }
  0x14   :  { %236 = shalt.err (!%p233_p9)
}
  0x15   :  { %21 = dma.hbm_to_vmem [thread:$0]  %s337_s0, 512, %s19_s18, [#allocation3]  }
  0x16   :  { %s285_s25 = smov [#allocation7]  }
  0x17   :  { %s38_s26 = sshll.u32 %s285_s25, 4  ;;  %s39_s26 = int_to_ptr.vmem [resolvable:$true] %s38_s26 }
  0x18   :  { %s245_s27 = scalar_lea.vmem %s39_s26, 64  ;;  %p250_p11 = scmp.lt.s32.totalorder %s39_s26, %s39_s26 }
  0x19   :  { %p246_p10 = scmp.ne.s32.totalorder %s39_s26, %s245_s27  ;;  %p251_p12 = scmp.lt.s32.totalorder %s245_s27, %s245_s27 }
  0x1b   :  { %p252_p13 = por %p251_p12, %p250_p11 }
  0x1d   :  { %p253_p0 = pnand %p252_p13, %p246_p10 }
  0x1f   :  { %256 = shalt.err (!%p253_p0)
}
  0x20   :  { %41 = dma.hbm_to_vmem [thread:$0]  %s339_s2, 64, %s39_s26, [#allocation6]  }
  0x21   :  { %277 = dma.done.wait [#allocation3], 512  }
  0x22   :  { %278 = vsyncadd [#allocation3], 4294966784 }
  0x23   :  { %279 = dma.done.wait [#allocation6], 128  }
  0x24   :  { %280 = vsyncadd [#allocation6], 4294967168  ;;  %v55_v0 = vld [vmem:[#allocation2 + $0x10] sm:$0xff]  ;;  %v53_v1 = vld [vmem:[#allocation2] sm:$0xff]  ;;  %s286_s0 = smov 127   ;;  %s287_s29 = smov 1   ;;  %v65_v4 = vlaneseq }
  0x25   :  { %61 = vrot.lane.b32.xlu1 %v55_v0, %s286_s0  ;;  %57 = vrot.lane.b32.xlu0 %v53_v1, %s286_s0  ;;  %v56_v2 = vld [vmem:[#allocation2 + $0x18] sm:$0xff]  ;;  %v54_v3 = vld [vmem:[#allocation2 + $0x8] sm:$0xff]  ;;  %v85_v8 = vld [vmem:[#allocation5] sm:$0xf] }
  0x26   :  { %v88_v5 = vshrl.u32 %v65_v4, 7  ;;  %v66_v7 = vand.u32 127, %v65_v4  ;;  %v111_v9 = vld [vmem:[#allocation7] sm:$0xf]  ;;  %v141_v17 = vld [vmem:[%s340_s3] sm:$0xf] }
  0x27   :  { %s288_s3 = smov [#allocation8]  }
  0x28   :  { %v93_v6 = vsub.s32 1, %v88_v5  ;;  %v97_v10 = vsub.s32 2, %v88_v5  ;;  %v89_v11 = vsub.s32 0, %v88_v5  ;;  %v101_v12 = vsub.s32 3, %v88_v5  ;;  %s181_s5 = sshll.u32 %s288_s3, 4  ;;  %s182_s5 = int_to_ptr.vmem [resolvable:$true] %s181_s5 }
  0x29   :  { %63 = vrot.lane.b32.xlu1 %v56_v2, %s286_s0  ;;  %59 = vrot.lane.b32.xlu0 %v54_v3, %s286_s0  ;;  %vm67_vm0 = vcmp.lt.s32.totalorder %v66_v7, 127  ;;  %vm80_vm1 = vcmp.lt.s32.totalorder %v66_v7, 1  ;;  %s257_s6 = scalar_lea.vmem %s182_s5, 512  ;;  %p262_p2 = scmp.lt.s32.totalorder %s182_s5, %s182_s5 }
  0x2a   :  { %v94_v15 = vrot.slane %v85_v8, %v93_v6  ;;  %v120_v16 = vrot.slane %v111_v9, %v93_v6  ;;  %v98_v18 = vrot.slane %v85_v8, %v97_v10  ;;  %v90_v19 = vrot.slane %v85_v8, %v89_v11  ;;  %p258_p1 = scmp.ne.s32.totalorder %s182_s5, %s257_s6  ;;  %p263_p3 = scmp.lt.s32.totalorder %s257_s6, %s257_s6 }
  0x2b   :  { %v102_v20 = vrot.slane %v85_v8, %v101_v12  ;;  %v124_v21 = vrot.slane %v111_v9, %v97_v10  ;;  %v128_v24 = vrot.slane %v111_v9, %v101_v12  ;;  %v116_v26 = vrot.slane %v111_v9, %v89_v11 }
  0x2c   :  { %v108_v28 = vmul.f32 %v94_v15, %v54_v3  ;;  %v150_v31 = vrot.slane %v141_v17, %v93_v6  ;;  %v109_v33 = vmul.f32 %v98_v18, %v55_v0  ;;  %v107_v34 = vmul.f32 %v90_v19, %v53_v1  ;;  %p264_p4 = por %p263_p3, %p262_p2 }
  0x2d   :  { %74 = vrot.lane.b32.xlu1 %v54_v3, %s287_s29  ;;  %72 = vrot.lane.b32.xlu0 %v53_v1, %s287_s29  ;;  %v110_v35 = vmul.f32 %v102_v20, %v56_v2  ;;  %v146_v41 = vrot.slane %v141_v17, %v89_v11  ;;  %v154_v42 = vrot.slane %v141_v17, %v97_v10 }
  0x2e   :  { %v158_v46 = vrot.slane %v141_v17, %v101_v12  ;;  %p265_p5 = pnand %p264_p4, %p258_p1 }
  0x31   :  { %78 = vrot.lane.b32.xlu1 %v56_v2, %s287_s29  ;;  %76 = vrot.lane.b32.xlu0 %v55_v0, %s287_s29 }
  0x97   :  { %v62_v13 = vpop.permute.xlu1 %61  ;;  %v58_v14 = vpop.permute.xlu0 %57 }
  0x9b   :  { %v64_v22 = vpop.permute.xlu1 %63  ;;  %v60_v23 = vpop.permute.xlu0 %59 }
  0x9c   :  { %v68_v25 = vsel %vm67_vm0, %v62_v13, %v64_v22  ;;  %v69_v27 = vsel %vm67_vm0, %v60_v23, %v62_v13  ;;  %v71_v29 = vsel %vm67_vm0, %v64_v22, %v58_v14  ;;  %v70_v32 = vsel %vm67_vm0, %v58_v14, %v60_v23 }
  0x9d   :  { %v134_v30 = vmul.f32 %v120_v16, %v69_v27  ;;  %v135_v36 = vmul.f32 %v124_v21, %v68_v25  ;;  %v136_v39 = vmul.f32 %v128_v24, %v71_v29  ;;  %v133_v43 = vmul.f32 %v116_v26, %v70_v32 }
  0x9f   :  { %v75_v37 = vpop.permute.xlu1 %74  ;;  %v73_v38 = vpop.permute.xlu0 %72  ;;  %v138_v44 = vadd.f32 %v134_v30, %v108_v28  ;;  %v139_v47 = vadd.f32 %v135_v36, %v109_v33  ;;  %v140_v51 = vadd.f32 %v136_v39, %v110_v35  ;;  %v137_v55 = vadd.f32 %v133_v43, %v107_v34 }
  0xa0   :  { %v83_v40 = vsel %vm80_vm1, %v73_v38, %v75_v37 }
  0xa1   :  { %v164_v45 = vmul.f32 %v150_v31, %v83_v40 }
  0xa3   :  { %v168_v48 = vadd.f32 %v164_v45, %v138_v44  ;;  %v79_v49 = vpop.permute.xlu1 %78  ;;  %v77_v50 = vpop.permute.xlu0 %76 }
  0xa4   :  { %v84_v52 = vsel %vm80_vm1, %v79_v49, %v73_v38  ;;  %v81_v53 = vsel %vm80_vm1, %v77_v50, %v79_v49  ;;  %v82_v54 = vsel %vm80_vm1, %v75_v37, %v77_v50 }
  0xa5   :  { %172 = vst [vmem:[#allocation8 + $0x8] sm:$0xff] %v168_v48  ;;  %v163_v56 = vmul.f32 %v146_v41, %v84_v52  ;;  %v165_v57 = vmul.f32 %v154_v42, %v82_v54  ;;  %v166_v58 = vmul.f32 %v158_v46, %v81_v53 }
  0xa7   :  { %v167_v59 = vadd.f32 %v163_v56, %v137_v55  ;;  %v169_v60 = vadd.f32 %v165_v57, %v139_v47  ;;  %v170_v61 = vadd.f32 %v166_v58, %v140_v51 }
  0xa9   :  { %171 = vst [vmem:[#allocation8] sm:$0xff] %v167_v59  ;;  %173 = vst [vmem:[#allocation8 + $0x10] sm:$0xff] %v169_v60 }
  0xaa   :  { %174 = vst [vmem:[#allocation8 + $0x18] sm:$0xff] %v170_v61 }
  0xab   :  { %268 = shalt.err (!%p265_p5)
}
  0xac   :  { %184 = dma.vmem_to_hbm [thread:$0]  %s182_s5, 512, %s341_s4, [#allocation4]  }
  0xad   :  { %281 = dma.done.wait [#allocation4], 512  }
  0xae   :  { %282 = vsyncadd [#allocation4], 4294966784 }
  0xaf   :  { %188 = vsyncpa [#allocation3], 1 }
  0xb0   :  { %189 = vsyncpa [#allocation6], 1 }
  0xb1   :  { %190 = vsyncpa [#allocation4], 1 }

</bundles_post_ra>
